<compile_context>
chip_gen: v7x
topology: tpu7x:2x2x1
jax: 0.10.0
libtpu: 0.0.40
codegen_flags: <defaults>
</compile_context>

<pallas_src>
import functools
import math

import jax
import jax.numpy as jnp
from jax.experimental import pallas as pl
from jax.experimental.pallas import tpu as pltpu


def _pe_add_kernel(x_ref, pe_ref, o_ref):
    # x_ref/o_ref: (tB, tC); pe_ref: (1, tC) broadcast over the batch rows.
    o_ref[...] = x_ref[...] + pe_ref[...]


def _pe_add_dropout_kernel(x_ref, pe_ref, bits_ref, o_ref, *, threshold, inv_keep):
    # keep iff uniform uint32 bits >= p * 2^32  (P(keep) = 1 - p)
    y = x_ref[...] + pe_ref[...]
    keep = bits_ref[...] >= jnp.uint32(threshold)
    scale = jnp.asarray(inv_keep, dtype=y.dtype)
    o_ref[...] = jnp.where(keep, y * scale, jnp.zeros_like(y))


def make_positional_encoding(d_model, max_length=1000, dtype=jnp.float32):
    """Sinusoidal PE buffer identical to the PyTorch module's __init__.

    (Like the PyTorch original, this assumes an even d_model.)
    """
    position = jnp.arange(max_length, dtype=jnp.float32)[:, None]
    div_term = jnp.exp(
        jnp.arange(0, d_model, 2, dtype=jnp.float32) * -(math.log(10000.0) / d_model)
    )
    pe = jnp.zeros((max_length, d_model), dtype=jnp.float32)
    pe = pe.at[:, 0::2].set(jnp.sin(position * div_term))
    pe = pe.at[:, 1::2].set(jnp.cos(position * div_term))
    return pe.astype(dtype)


def _pick_tile(dim, pack, cap):
    """Largest tile <= cap that divides `dim` and is a multiple of `pack`;
    falls back to the full dim (always a legal TPU block extent)."""
    if dim <= cap:
        return dim
    t = (cap // pack) * pack
    while t >= pack:
        if dim % t == 0:
            return t
        t -= pack
    return dim


def positional_encoding_forward(x, pe, *, dropout_p=0.1, training=False, rng_key=None):
    """out = dropout(x + pe[:seq]) with the add + dropout fused in one Pallas kernel."""
    B, S, D = x.shape
    C = S * D

    p = float(dropout_p)
    apply_dropout = bool(training) and p > 0.0
    if apply_dropout and p >= 1.0:
        return jnp.zeros_like(x)  # nn.Dropout(p=1) zeroes everything

    # Lane-dense 2-D views: x (B, S*D), pe (1, S*D) broadcast over batch rows.
    xf = x.reshape(B, C)
    pef = pe[:S, :].astype(x.dtype).reshape(1, C)

    # Rows in multiples of 8 (sublanes), cols in multiples of 128 (lanes);
    # cap each tile at ~128K elements (512 KiB f32) so double-buffered tiles
    # fit every generation's scoped-VMEM default.
    tB = _pick_tile(B, 8, 64)
    tC = _pick_tile(C, 128, 128 * 1024)
    grid = (C // tC, B // tB)  # batch-tile axis innermost -> PE tile reused

    x_spec = pl.BlockSpec((tB, tC), lambda c, b: (b, c))
    pe_spec = pl.BlockSpec((1, tC), lambda c, b: (0, c))
    out_spec = pl.BlockSpec((tB, tC), lambda c, b: (b, c))

    compiler_params = pltpu.CompilerParams(
        dimension_semantics=("parallel", "parallel")
    )
    out_shape = jax.ShapeDtypeStruct((B, C), x.dtype)

    if apply_dropout:
        if rng_key is None:
            rng_key = jax.random.PRNGKey(0)
        bits = jax.random.bits(rng_key, (B, C), dtype=jnp.uint32)
        threshold = min(int(round(p * (1 << 32))), (1 << 32) - 1)
        kernel = functools.partial(
            _pe_add_dropout_kernel,
            threshold=threshold,
            inv_keep=1.0 / (1.0 - p),
        )
        out = pl.pallas_call(
            kernel,
            out_shape=out_shape,
            grid=grid,
            in_specs=[x_spec, pe_spec, pl.BlockSpec((tB, tC), lambda c, b: (b, c))],
            out_specs=out_spec,
            compiler_params=compiler_params,
        )(xf, pef, bits)
    else:
        out = pl.pallas_call(
            _pe_add_kernel,
            out_shape=out_shape,
            grid=grid,
            in_specs=[x_spec, pe_spec],
            out_specs=out_spec,
            compiler_params=compiler_params,
        )(xf, pef)

    return out.reshape(B, S, D)


if __name__ == "__main__":
    B, S, D = 2, 8, 32
    dropout_p = 0.1

    root = jax.random.PRNGKey(0)
    x_key, drop_key = jax.random.split(root)
    x = jax.random.normal(x_key, (B, S, D), dtype=jnp.float32)
    pe = make_positional_encoding(D, max_length=1000)

    # Eval mode: dropout is the identity -> exact reference check.
    out_eval = jax.block_until_ready(
        positional_encoding_forward(x, pe, dropout_p=dropout_p, training=False)
    )
    ref_eval = x + pe[None, :S, :]
    assert out_eval.shape == (B, S, D)
    assert jnp.allclose(out_eval, ref_eval, atol=1e-6, rtol=1e-6)

    # Training mode: rebuild the same mask bits outside the kernel and check
    # the masked + scaled result exactly.
    out_train = jax.block_until_ready(
        positional_encoding_forward(
            x, pe, dropout_p=dropout_p, training=True, rng_key=drop_key
        )
    )
    bits = jax.random.bits(drop_key, (B, S * D), dtype=jnp.uint32).reshape(B, S, D)
    threshold = min(int(round(dropout_p * (1 << 32))), (1 << 32) - 1)
    keep = bits >= jnp.uint32(threshold)
    ref_train = jnp.where(
        keep, (x + pe[None, :S, :]) * jnp.float32(1.0 / (1.0 - dropout_p)), 0.0
    )
    assert out_train.shape == (B, S, D)
    assert jnp.allclose(out_train, ref_train, atol=1e-6, rtol=1e-6)

    print("KERNEL_OK")
</pallas_src>

<mosaic_0001>
module attributes {stable_mosaic.version = 11 : i64} {
  func.func @_pe_add_kernel(%arg0: i32, %arg1: i32, %arg2: memref<2x256xf32, #tpu.memory_space<vmem>>, %arg3: memref<1x256xf32, #tpu.memory_space<vmem>>, %arg4: memref<2x256xf32, #tpu.memory_space<vmem>>) attributes {dimension_semantics = [#tpu.dimension_semantics<parallel>, #tpu.dimension_semantics<parallel>], iteration_bounds = array<i64: 1, 1>, scalar_prefetch = 0 : i64, scratch_operands = 0 : i64, tpu.core_type = #tpu.core_type<tc>, window_params = [{transform_indices = @transform_0, window_bounds = array<i64: 2, 256>}, {transform_indices = @transform_1, window_bounds = array<i64: 1, 256>}, {transform_indices = @transform_2, window_bounds = array<i64: 2, 256>}]} {
    %c0 = arith.constant 0 : index
    %c0_0 = arith.constant 0 : index
    %0 = vector.load %arg2[%c0, %c0_0] : memref<2x256xf32, #tpu.memory_space<vmem>>, vector<2x256xf32>
    %c0_1 = arith.constant 0 : index
    %c0_2 = arith.constant 0 : index
    %1 = vector.load %arg3[%c0_1, %c0_2] : memref<1x256xf32, #tpu.memory_space<vmem>>, vector<1x256xf32>
    %2 = vector.broadcast %1 : vector<1x256xf32> to vector<2x256xf32>
    %3 = arith.addf %0, %2 : vector<2x256xf32>
    %c0_3 = arith.constant 0 : index
    %c0_4 = arith.constant 0 : index
    %4 = vector.load %arg4[%c0_3, %c0_4] : memref<2x256xf32, #tpu.memory_space<vmem>>, vector<2x256xf32>
    tpu.vector_store %arg4[%c0_3, %c0_4], %3 {strides = array<i32>} : memref<2x256xf32, #tpu.memory_space<vmem>>, vector<2x256xf32>,
    return
  }
  func.func @transform_0(%arg0: i32, %arg1: i32) -> (i32, i32) {
    %c0_i32 = arith.constant 0 : i32
    return %arg1, %arg0 : i32, i32
  }
  func.func @transform_1(%arg0: i32, %arg1: i32) -> (i32, i32) {
    %c0_i32 = arith.constant 0 : i32
    %c0_i32_0 = arith.constant 0 : i32
    return %c0_i32, %arg0 : i32, i32
  }
  func.func @transform_2(%arg0: i32, %arg1: i32) -> (i32, i32) {
    %c0_i32 = arith.constant 0 : i32
    return %arg1, %arg0 : i32, i32
  }
}

</mosaic_0001>

<bundles_post_ra>
// kernel: tpu_custom_call.1
= control target key start
LH: loop header
LB: loop body
LE: loop exit
PB: predicated region body
PF: predicated region fallthrough
CT: control target
= control target key end

     0   :  { %7 = vsyncpa [#allocation3], 0  ;;  %s157_s0 = inlined_call_operand.hbm [shape: f32[2,256], index: 0, kind: input, shape index: {}]   ;;  %s158_s1 = inlined_call_operand.vmem [shape: f32[1,256], index: 1, kind: input, shape index: {}]   ;;  %s159_s2 = inlined_call_operand.hbm [shape: f32[2,256], index: 2, kind: output, shape index: {}]  }
   0x1   :  { %8 = vsyncpa [#allocation4], 0  ;;  %s112_s9 = smov [#allocation2]   ;;  %s64_s13 = scalar_lea.hbm %s157_s0, 64 }
   0x2   :  { %s15_s10 = sshll.u32 %s112_s9, 4  ;;  %p65_p0 = scmp.ne.s32.totalorder %s157_s0, %s64_s13  ;;  %s16_s10 = int_to_ptr.vmem [resolvable:$true] %s15_s10 }
   0x3   :  { %p68_p1 = scmp.lt.u32.totalorder %s64_s13, %s157_s0 }
   0x5   :  { %p70_p2 = pnand %p68_p1, %p65_p0 }
   0x7   :  { %73 = shalt.err (!%p70_p2)
}
   0x8   :  { %s74_s18 = scalar_lea.vmem %s16_s10, 64  ;;  %p79_p4 = scmp.lt.s32.totalorder %s16_s10, %s16_s10 }
   0x9   :  { %p75_p3 = scmp.ne.s32.totalorder %s16_s10, %s74_s18  ;;  %p80_p5 = scmp.lt.s32.totalorder %s74_s18, %s74_s18 }
   0xb   :  { %p81_p6 = por %p80_p5, %p79_p4 }
   0xd   :  { %p82_p7 = pnand %p81_p6, %p75_p3 }
   0xf   :  { %85 = shalt.err (!%p82_p7)
}
  0x10   :  { %18 = dma.hbm_to_vmem [thread:$0]  %s157_s0, 64, %s16_s10, [#allocation3]  }
  0x11   :  { %108 = dma.done.wait [#allocation3], 64  }
  0x12   :  { %109 = vsyncadd [#allocation3], 4294967232  ;;  %v27_v0 = vlaneseq  ;;  %v113_v1 = vmov 1983009808   ;;  %v25_v7 = vld [vmem:[%s158_s1] sm:$0x3] }
  0x13   :  { %v37_v2 = vunpack.c.l.s4 %v113_v1  ;;  %v24_v12 = vld [vmem:[#allocation2] sm:$0xf]  ;;  %s114_s23 = smov [#allocation5]  }
  0x14   :  { %v28_v3 = vshrl.u32 %v27_v0, 7  ;;  %s52_s0 = sshll.u32 %s114_s23, 4  ;;  %s53_s0 = int_to_ptr.vmem [resolvable:$true] %s52_s0 }
  0x15   :  { %v38_v6 = vunpack.c.0.s8 %v37_v2  ;;  %s86_s24 = scalar_lea.vmem %s53_s0, 64  ;;  %p91_p9 = scmp.lt.s32.totalorder %s53_s0, %s53_s0 }
  0x16   :  { %v29_v4 = vsub.s32 0, %v28_v3  ;;  %v33_v5 = vsub.s32 1, %v28_v3  ;;  %p87_p8 = scmp.ne.s32.totalorder %s53_s0, %s86_s24  ;;  %p92_p10 = scmp.lt.s32.totalorder %s86_s24, %s86_s24 }
  0x17   :  { %v41_v10 = vsub.s32 %v38_v6, %v28_v3 }
  0x18   :  { %v30_v8 = vrot.slane %v25_v7, %v29_v4  ;;  %v34_v9 = vrot.slane %v25_v7, %v33_v5  ;;  %p93_p11 = por %p92_p10, %p91_p9 }
  0x1a   :  { %v35_v11 = vcombine.low %v30_v8, %v34_v9  ;;  %p94_p12 = pnand %p93_p11, %p87_p8 }
  0x1c   :  { %v42_v13 = vrot.slane %v35_v11, %v41_v10 }
  0x1e   :  { %v44_v14 = vadd.f32 %v42_v13, %v24_v12 }
  0x20   :  { %45 = vst [vmem:[#allocation5] sm:$0xf] %v44_v14 }
  0x21   :  { %97 = shalt.err (!%p94_p12)
}
  0x22   :  { %s98_s26 = scalar_lea.hbm %s159_s2, 64 }
  0x23   :  { %p99_p13 = scmp.ne.s32.totalorder %s159_s2, %s98_s26  ;;  %p102_p0 = scmp.lt.u32.totalorder %s98_s26, %s159_s2 }
  0x25   :  { %p104_p1 = pnand %p102_p0, %p99_p13 }
  0x27   :  { %107 = shalt.err (!%p104_p1)
}
  0x28   :  { %55 = dma.vmem_to_hbm [thread:$0]  %s53_s0, 64, %s159_s2, [#allocation4]  }
  0x29   :  { %110 = dma.done.wait [#allocation4], 64  }
  0x2a   :  { %111 = vsyncadd [#allocation4], 4294967232 }
  0x2b   :  { %59 = vsyncpa [#allocation3], 1 }
  0x2c   :  { %60 = vsyncpa [#allocation4], 1 }

</bundles_post_ra>
